<compile_context>
chip_gen: v7x
topology: tpu7x:2x2x1
jax: 0.10.0
libtpu: 0.0.40
codegen_flags: <defaults>
</compile_context>

<pallas_src>
import math

import jax
import jax.numpy as jnp
from jax.experimental import pallas as pl
from jax.experimental.pallas import tpu as pltpu


def _round_up(x, m):
    return ((x + m - 1) // m) * m


# ---------------------------------------------------------------------------
# Architecture construction (mirrors Conv1DNet.__init__ math exactly)
# ---------------------------------------------------------------------------
def build_conv1dnet_config(length, num_channels, out_size, num_expand, num_contract,
                           expand_factor, size_factor=3, pad_factor=1,
                           stride_factor=0, min_kernel=2):
    planes = [num_channels]
    if num_expand > 0:
        expand = float((planes[0] * expand_factor - planes[0]) / num_expand)
        planes += [int(round(planes[0] + expand * (i + 1))) for i in range(num_expand)]
    contract_factor = float((planes[-1] - out_size) / num_contract)
    start_n = planes[-1]
    planes += [int(round(start_n - contract_factor * (i + 1))) for i in range(num_contract)]
    planes[-1] = out_size

    n = num_expand + num_contract
    layers = []
    L = length
    for i in range(n):
        if n > 1:
            decay_factor = 1.0 - i / (n - 1)
            st = int(round(stride_factor * i / (n - 1)))
        else:
            decay_factor = 1.0
            st = int(stride_factor)
        if st < 1:
            st = 1
        fs = int(math.ceil(size_factor * decay_factor))
        if fs < min_kernel:
            fs = min_kernel
        pd = int(round(pad_factor * ((fs - 1) / 2.0) * decay_factor))
        l_out = (L + 2 * pd - fs) // st + 1
        layers.append(dict(nin=planes[i], nout=planes[i + 1], fs=fs, st=st, pd=pd,
                           l_in=L, l_out=l_out,
                           cpad=_round_up(planes[i], 8),
                           nout_pad=_round_up(planes[i + 1], 8)))
        L = l_out
    return layers


# ---------------------------------------------------------------------------
# Host-side parameter preparation (hoisted out of the forward path)
# ---------------------------------------------------------------------------
def prepare_params(params, layer_cfgs, eps=1e-5):
    """Fold eval-mode BN scale + conv bias into the conv weights / one shift
    vector per layer, reshape into im2col layout (input channels padded to 8,
    output channels padded to 8 so buffers chain without row zero-fills), and
    pack every layer into two padded arrays."""
    m_max = max(cfg["nout_pad"] for cfg in layer_cfgs)
    k_max = max(cfg["fs"] * cfg["cpad"] for cfg in layer_cfgs)
    ws, ss = [], []
    for (w, b, gamma, beta, rm, rv), cfg in zip(params, layer_cfgs):
        nout, nin, fs = w.shape
        cpad, npad = cfg["cpad"], cfg["nout_pad"]
        inv_std = 1.0 / jnp.sqrt(rv + eps)
        scale = gamma * inv_std                                   # (nout,)
        shift = beta + scale * (b - rm)                           # (nout,)
        wt = jnp.transpose(w, (0, 2, 1)) * scale[:, None, None]   # (nout, fs, nin)
        wt = jnp.pad(wt, ((0, npad - nout), (0, 0), (0, cpad - nin)))
        w2 = wt.reshape(npad, fs * cpad)                          # zero rows >= nout
        ws.append(jnp.pad(w2, ((0, m_max - npad), (0, k_max - fs * cpad))))
        ss.append(jnp.pad(shift, (0, m_max - nout)).reshape(m_max, 1))
    return (jnp.stack(ws).astype(jnp.float32),     # (n_layers, m_max, k_max)
            jnp.stack(ss).astype(jnp.float32))     # (n_layers, m_max, 1)


# ---------------------------------------------------------------------------
# Fused Pallas kernel: all Conv1d+BN(eval)+ReLU layers in one pass
# ---------------------------------------------------------------------------
def _make_fused_kernel(layer_cfgs, width):
    n_layers = len(layer_cfgs)

    def lane_roll(x, shift):
        # Circular shift along lanes: out[:, c] = x[:, (c - shift) % width].
        # Explicit slice+concat (== jnp.roll's static lowering) for unambiguous
        # semantics.  TODO(synk): switch to pltpu.roll to use the idle XLU slot.
        s = shift % width
        if s == 0:
            return x
        return jnp.concatenate([x[:, width - s:], x[:, :width - s]], axis=1)

    def kernel(x_ref, w_ref, s_ref, m_ref, o_ref):
        # Whole stack on vreg-resident values: one load, one lane-dense store.
        cur = x_ref[...]
        for l, cfg in enumerate(layer_cfgs):
            fs, pd = cfg["fs"], cfg["pd"]
            m = cfg["nout_pad"]
            k = fs * cfg["cpad"]
            # im2col patch: all taps (and all samples along lanes) -> ONE matmul.
            taps = [lane_roll(cur, pd - t) for t in range(fs)]
            patch = taps[0] if fs == 1 else jnp.concatenate(taps, axis=0)  # (k, W)
            w2 = w_ref[l, 0:m, 0:k]        # BN scale folded in, rows >= nout zero
            shift = s_ref[l, 0:m, :]       # conv bias + BN shift folded, (m, 1)
            y = jnp.dot(w2, patch, preferred_element_type=jnp.float32)
            # ReLU + mask: zeroes lanes outside each sample's valid window,
            # which is exactly the next layer's zero padding (no zero-fills).
            cur = jnp.maximum(y + shift, 0.0) * m_ref[l]
        o_ref[...] = cur.astype(o_ref.dtype)

    return kernel


def conv1dnet_forward(x, w_packed, s_packed, layer_cfgs, *, batch_block=None):
    N, nin0, L0 = x.shape
    cfg0, cfg_last = layer_cfgs[0], layer_cfgs[-1]
    # TODO(synk): stride > 1 layers (stride_factor > 0) would need strided tap
    #             gathers; not exercised by this module's default config.
    assert all(cfg["st"] == 1 for cfg in layer_cfgs), "stride > 1 not supported"

    # Single grid step by default (best on single-TC v5e/v6e: no per-step
    # overhead).  On v7x pass batch_block=N//2 so the "parallel" axis is
    # sharded across both TensorCores.
    if batch_block is None:
        batch_block = N
    assert N % batch_block == 0
    nb = batch_block
    grid_n = N // nb

    # Per-sample lane slab: data at [b*LS + OFF, b*LS + OFF + l), zeros between.
    off = max(cfg["pd"] for cfg in layer_cfgs)
    ls = off + max(max(cfg["l_in"] + cfg["pd"], cfg["l_out"]) for cfg in layer_cfgs)
    if grid_n > 1:
        # Non-full blocks need a lane dim that is a multiple of 128.
        ls = _round_up(ls, 128 // math.gcd(nb, 128))
    width = nb * ls
    cpad0 = cfg0["cpad"]

    # Pre-stage the input on the host into the kernel's padded lane layout:
    # x_arr[c, n*LS + OFF + j] = x[n, c, j]; zeros give conv/channel padding.
    xp = jnp.pad(x.astype(jnp.float32),
                 ((0, 0), (0, cpad0 - nin0), (off, ls - off - L0)))
    x_arr = jnp.transpose(xp, (1, 0, 2)).reshape(cpad0, N * ls)

    # Per-layer {0,1} masks over the block's lanes (valid output window per sample).
    pos = jnp.arange(width) % ls
    masks = jnp.stack(
        [((pos >= off) & (pos < off + cfg["l_out"])).astype(jnp.float32)
         for cfg in layer_cfgs])[:, None, :]                     # (n_layers, 1, width)

    m_last = cfg_last["nout_pad"]
    kernel = _make_fused_kernel(layer_cfgs, width)

    flops = 2 * sum(cfg["nout_pad"] * cfg["fs"] * cfg["cpad"]
                    for cfg in layer_cfgs) * N * ls
    bytes_accessed = 4 * (x_arr.size + w_packed.size + s_packed.size
                          + masks.size + m_last * N * ls)

    out_arr = pl.pallas_call(
        kernel,
        out_shape=jax.ShapeDtypeStruct((m_last, N * ls), jnp.float32),
        grid_spec=pltpu.PrefetchScalarGridSpec(
            num_scalar_prefetch=0,
            grid=(grid_n,),
            in_specs=[
                pl.BlockSpec((cpad0, width), lambda g: (0, g)),
                pl.BlockSpec(w_packed.shape, lambda g: (0, 0, 0)),
                pl.BlockSpec(s_packed.shape, lambda g: (0, 0, 0)),
                pl.BlockSpec(masks.shape, lambda g: (0, 0, 0)),
            ],
            out_specs=pl.BlockSpec((m_last, width), lambda g: (0, g))),
        compiler_params=pltpu.CompilerParams(
            dimension_semantics=("parallel",),
            vmem_limit_bytes=32 * 1024 * 1024),
        cost_estimate=pl.CostEstimate(flops=int(flops), transcendentals=0,
                                      bytes_accessed=int(bytes_accessed)),
    )(x_arr, w_packed, s_packed, masks)

    # Un-stage: pick each sample's valid lanes and real output channels.
    out = out_arr.reshape(m_last, N, ls)[:cfg_last["nout"], :,
                                         off:off + cfg_last["l_out"]]
    return jnp.transpose(out, (1, 0, 2))              # (N, out_size, l_out)


# ---------------------------------------------------------------------------
# Pure-JAX reference for verification
# ---------------------------------------------------------------------------
def reference_forward(x, params, layer_cfgs, eps=1e-5):
    for (w, b, gamma, beta, rm, rv), cfg in zip(params, layer_cfgs):
        y = jax.lax.conv_general_dilated(
            x, w, window_strides=(cfg["st"],), padding=[(cfg["pd"], cfg["pd"])],
            dimension_numbers=("NCH", "OIH", "NCH"))
        y = y + b.reshape(1, -1, 1)
        y = (y - rm.reshape(1, -1, 1)) / jnp.sqrt(rv.reshape(1, -1, 1) + eps)
        y = y * gamma.reshape(1, -1, 1) + beta.reshape(1, -1, 1)
        x = jnp.maximum(y, 0.0)
    return x


# ---------------------------------------------------------------------------
if __name__ == "__main__":
    # Small Conv1DNet: length=16, num_channels=4, out_size=8,
    # num_expand=2, num_contract=2, expand_factor=4 (defaults otherwise).
    length, num_channels, out_size = 16, 4, 8
    layer_cfgs = build_conv1dnet_config(length, num_channels, out_size,
                                        num_expand=2, num_contract=2, expand_factor=4)

    key = jax.random.PRNGKey(0)
    params = []
    for cfg in layer_cfgs:
        key, kw, kb, kg, kbe, km, kv = jax.random.split(key, 7)
        w = 0.1 * jax.random.normal(kw, (cfg["nout"], cfg["nin"], cfg["fs"]), jnp.float32)
        b = 0.1 * jax.random.normal(kb, (cfg["nout"],), jnp.float32)
        # Eval-mode BatchNorm1d with non-trivial running statistics.
        # TODO(synk): training-mode batch statistics (reduction over N, L) not implemented.
        gamma = 1.0 + 0.1 * jax.random.normal(kg, (cfg["nout"],), jnp.float32)
        beta = 0.1 * jax.random.normal(kbe, (cfg["nout"],), jnp.float32)
        rm = 0.1 * jax.random.normal(km, (cfg["nout"],), jnp.float32)
        rv = jax.random.uniform(kv, (cfg["nout"],), jnp.float32, 0.5, 1.5)
        params.append((w, b, gamma, beta, rm, rv))

    # Hoisted out of the forward path: BN/bias folding + im2col packing, once.
    w_packed, s_packed = prepare_params(params, layer_cfgs)

    key, kx = jax.random.split(key)
    x = jax.random.normal(kx, (2, num_channels, length), jnp.float32)  # NCL

    out = jax.block_until_ready(conv1dnet_forward(x, w_packed, s_packed, layer_cfgs))
    ref = jax.block_until_ready(reference_forward(x, params, layer_cfgs))

    assert out.shape == ref.shape, (out.shape, ref.shape)
    err = float(jnp.max(jnp.abs(out - ref)))
    assert jnp.allclose(out, ref, rtol=1e-4, atol=1e-4), err

    print("KERNEL_OK")
</pallas_src>

<mosaic_0001>
module attributes {stable_mosaic.version = 11 : i64} {
  func.func @kernel(%arg0: i32, %arg1: memref<8x36xf32, #tpu.memory_space<vmem>>, %arg2: memref<4x16x32xf32, #tpu.memory_space<vmem>>, %arg3: memref<4x16x1xf32, #tpu.memory_space<vmem>>, %arg4: memref<4x1x36xf32, #tpu.memory_space<vmem>>, %arg5: memref<8x36xf32, #tpu.memory_space<vmem>>) attributes {dimension_semantics = [#tpu.dimension_semantics<parallel>], iteration_bounds = array<i64: 1>, scalar_prefetch = 0 : i64, scratch_operands = 0 : i64, tpu.core_type = #tpu.core_type<tc>, window_params = [{transform_indices = @transform_0, window_bounds = array<i64: 8, 36>}, {pipeline_mode = #tpu.pipeline_mode<synchronous>, transform_indices = @transform_1, window_bounds = array<i64: 4, 16, 32>}, {pipeline_mode = #tpu.pipeline_mode<synchronous>, transform_indices = @transform_2, window_bounds = array<i64: 4, 16, 1>}, {pipeline_mode = #tpu.pipeline_mode<synchronous>, transform_indices = @transform_3, window_bounds = array<i64: 4, 1, 36>}, {transform_indices = @transform_4, window_bounds = array<i64: 8, 36>}]} {
    %c0 = arith.constant 0 : index
    %c0_0 = arith.constant 0 : index
    %0 = vector.load %arg1[%c0, %c0_0] : memref<8x36xf32, #tpu.memory_space<vmem>>, vector<8x36xf32>
    %1 = vector.extract_strided_slice %0 {offsets = [0, 35], sizes = [8, 1], strides = [1, 1]} : vector<8x36xf32> to vector<8x1xf32>
    %2 = vector.extract_strided_slice %0 {offsets = [0, 0], sizes = [8, 35], strides = [1, 1]} : vector<8x36xf32> to vector<8x35xf32>
    %3 = tpu.concatenate %1, %2 in 1 : vector<8x1xf32>, vector<8x35xf32> -> vector<8x36xf32>
    %4 = vector.extract_strided_slice %0 {offsets = [0, 1], sizes = [8, 35], strides = [1, 1]} : vector<8x36xf32> to vector<8x35xf32>
    %5 = vector.extract_strided_slice %0 {offsets = [0, 0], sizes = [8, 1], strides = [1, 1]} : vector<8x36xf32> to vector<8x1xf32>
    %6 = tpu.concatenate %4, %5 in 1 : vector<8x35xf32>, vector<8x1xf32> -> vector<8x36xf32>
    %7 = tpu.concatenate %3, %0, %6 in 0 : vector<8x36xf32>, vector<8x36xf32>, vector<8x36xf32> -> vector<24x36xf32>
    %c0_1 = arith.constant 0 : index
    %c0_2 = arith.constant 0 : index
    %c0_3 = arith.constant 0 : index
    %8 = vector.load %arg2[%c0_1, %c0_2, %c0_3] : memref<4x16x32xf32, #tpu.memory_space<vmem>>, vector<1x16x24xf32>
    %9 = vector.shape_cast %8 : vector<1x16x24xf32> to vector<16x24xf32>
    %c0_4 = arith.constant 0 : index
    %c0_5 = arith.constant 0 : index
    %c0_6 = arith.constant 0 : index
    %10 = vector.load %arg3[%c0_4, %c0_5, %c0_6] : memref<4x16x1xf32, #tpu.memory_space<vmem>>, vector<1x16x1xf32>
    %11 = vector.shape_cast %10 : vector<1x16x1xf32> to vector<16x1xf32>
    %cst = arith.constant dense<0.000000e+00> : vector<16x36xf32>
    %12 = tpu.matmul %9, %7, %cst {dimension_numbers = #tpu.dot_dimension_numbers<[1], [0], [0], [1], [0, 0, 1, 1], [], []>} : vector<16x24xf32>, vector<24x36xf32>, vector<16x36xf32> -> vector<16x36xf32>
    %13 = vector.broadcast %11 : vector<16x1xf32> to vector<16x36xf32>
    %14 = arith.addf %12, %13 : vector<16x36xf32>
    %cst_7 = arith.constant 0.000000e+00 : f32
    %15 = vector.broadcast %cst_7 : f32 to vector<16x36xf32>
    %16 = arith.maximumf %14, %15 : vector<16x36xf32>
    %c0_8 = arith.constant 0 : index
    %c0_9 = arith.constant 0 : index
    %c0_10 = arith.constant 0 : index
    %17 = vector.load %arg4[%c0_8, %c0_9, %c0_10] : memref<4x1x36xf32, #tpu.memory_space<vmem>>, vector<1x1x36xf32>
    %18 = vector.shape_cast %17 : vector<1x1x36xf32> to vector<1x36xf32>
    %19 = vector.broadcast %18 : vector<1x36xf32> to vector<16x36xf32>
    %20 = arith.mulf %16, %19 : vector<16x36xf32>
    %21 = vector.extract_strided_slice %20 {offsets = [0, 1], sizes = [16, 35], strides = [1, 1]} : vector<16x36xf32> to vector<16x35xf32>
    %22 = vector.extract_strided_slice %20 {offsets = [0, 0], sizes = [16, 1], strides = [1, 1]} : vector<16x36xf32> to vector<16x1xf32>
    %23 = tpu.concatenate %21, %22 in 1 : vector<16x35xf32>, vector<16x1xf32> -> vector<16x36xf32>
    %24 = tpu.concatenate %20, %23 in 0 : vector<16x36xf32>, vector<16x36xf32> -> vector<32x36xf32>
    %c1 = arith.constant 1 : index
    %c0_11 = arith.constant 0 : index
    %c0_12 = arith.constant 0 : index
    %25 = vector.load %arg2[%c1, %c0_11, %c0_12] : memref<4x16x32xf32, #tpu.memory_space<vmem>>, vector<1x16x32xf32>
    %26 = vector.shape_cast %25 : vector<1x16x32xf32> to vector<16x32xf32>
    %c1_13 = arith.constant 1 : index
    %c0_14 = arith.constant 0 : index
    %c0_15 = arith.constant 0 : index
    %27 = vector.load %arg3[%c1_13, %c0_14, %c0_15] : memref<4x16x1xf32, #tpu.memory_space<vmem>>, vector<1x16x1xf32>
    %28 = vector.shape_cast %27 : vector<1x16x1xf32> to vector<16x1xf32>
    %cst_16 = arith.constant dense<0.000000e+00> : vector<16x36xf32>
    %29 = tpu.matmul %26, %24, %cst_16 {dimension_numbers = #tpu.dot_dimension_numbers<[1], [0], [0], [1], [0, 0, 1, 1], [], []>} : vector<16x32xf32>, vector<32x36xf32>, vector<16x36xf32> -> vector<16x36xf32>
    %30 = vector.broadcast %28 : vector<16x1xf32> to vector<16x36xf32>
    %31 = arith.addf %29, %30 : vector<16x36xf32>
    %cst_17 = arith.constant 0.000000e+00 : f32
    %32 = vector.broadcast %cst_17 : f32 to vector<16x36xf32>
    %33 = arith.maximumf %31, %32 : vector<16x36xf32>
    %c1_18 = arith.constant 1 : index
    %c0_19 = arith.constant 0 : index
    %c0_20 = arith.constant 0 : index
    %34 = vector.load %arg4[%c1_18, %c0_19, %c0_20] : memref<4x1x36xf32, #tpu.memory_space<vmem>>, vector<1x1x36xf32>
    %35 = vector.shape_cast %34 : vector<1x1x36xf32> to vector<1x36xf32>
    %36 = vector.broadcast %35 : vector<1x36xf32> to vector<16x36xf32>
    %37 = arith.mulf %33, %36 : vector<16x36xf32>
    %38 = vector.extract_strided_slice %37 {offsets = [0, 1], sizes = [16, 35], strides = [1, 1]} : vector<16x36xf32> to vector<16x35xf32>
    %39 = vector.extract_strided_slice %37 {offsets = [0, 0], sizes = [16, 1], strides = [1, 1]} : vector<16x36xf32> to vector<16x1xf32>
    %40 = tpu.concatenate %38, %39 in 1 : vector<16x35xf32>, vector<16x1xf32> -> vector<16x36xf32>
    %41 = tpu.concatenate %37, %40 in 0 : vector<16x36xf32>, vector<16x36xf32> -> vector<32x36xf32>
    %c2 = arith.constant 2 : index
    %c0_21 = arith.constant 0 : index
    %c0_22 = arith.constant 0 : index
    %42 = vector.load %arg2[%c2, %c0_21, %c0_22] : memref<4x16x32xf32, #tpu.memory_space<vmem>>, vector<1x16x32xf32>
    %43 = vector.shape_cast %42 : vector<1x16x32xf32> to vector<16x32xf32>
    %c2_23 = arith.constant 2 : index
    %c0_24 = arith.constant 0 : index
    %c0_25 = arith.constant 0 : index
    %44 = vector.load %arg3[%c2_23, %c0_24, %c0_25] : memref<4x16x1xf32, #tpu.memory_space<vmem>>, vector<1x16x1xf32>
    %45 = vector.shape_cast %44 : vector<1x16x1xf32> to vector<16x1xf32>
    %cst_26 = arith.constant dense<0.000000e+00> : vector<16x36xf32>
    %46 = tpu.matmul %43, %41, %cst_26 {dimension_numbers = #tpu.dot_dimension_numbers<[1], [0], [0], [1], [0, 0, 1, 1], [], []>} : vector<16x32xf32>, vector<32x36xf32>, vector<16x36xf32> -> vector<16x36xf32>
    %47 = vector.broadcast %45 : vector<16x1xf32> to vector<16x36xf32>
    %48 = arith.addf %46, %47 : vector<16x36xf32>
    %cst_27 = arith.constant 0.000000e+00 : f32
    %49 = vector.broadcast %cst_27 : f32 to vector<16x36xf32>
    %50 = arith.maximumf %48, %49 : vector<16x36xf32>
    %c2_28 = arith.constant 2 : index
    %c0_29 = arith.constant 0 : index
    %c0_30 = arith.constant 0 : index
    %51 = vector.load %arg4[%c2_28, %c0_29, %c0_30] : memref<4x1x36xf32, #tpu.memory_space<vmem>>, vector<1x1x36xf32>
    %52 = vector.shape_cast %51 : vector<1x1x36xf32> to vector<1x36xf32>
    %53 = vector.broadcast %52 : vector<1x36xf32> to vector<16x36xf32>
    %54 = arith.mulf %50, %53 : vector<16x36xf32>
    %55 = vector.extract_strided_slice %54 {offsets = [0, 1], sizes = [16, 35], strides = [1, 1]} : vector<16x36xf32> to vector<16x35xf32>
    %56 = vector.extract_strided_slice %54 {offsets = [0, 0], sizes = [16, 1], strides = [1, 1]} : vector<16x36xf32> to vector<16x1xf32>
    %57 = tpu.concatenate %55, %56 in 1 : vector<16x35xf32>, vector<16x1xf32> -> vector<16x36xf32>
    %58 = tpu.concatenate %54, %57 in 0 : vector<16x36xf32>, vector<16x36xf32> -> vector<32x36xf32>
    %c3 = arith.constant 3 : index
    %c0_31 = arith.constant 0 : index
    %c0_32 = arith.constant 0 : index
    %59 = vector.load %arg2[%c3, %c0_31, %c0_32] : memref<4x16x32xf32, #tpu.memory_space<vmem>>, vector<1x8x32xf32>
    %60 = vector.shape_cast %59 : vector<1x8x32xf32> to vector<8x32xf32>
    %c3_33 = arith.constant 3 : index
    %c0_34 = arith.constant 0 : index
    %c0_35 = arith.constant 0 : index
    %61 = vector.load %arg3[%c3_33, %c0_34, %c0_35] : memref<4x16x1xf32, #tpu.memory_space<vmem>>, vector<1x8x1xf32>
    %62 = vector.shape_cast %61 : vector<1x8x1xf32> to vector<8x1xf32>
    %cst_36 = arith.constant dense<0.000000e+00> : vector<8x36xf32>
    %63 = tpu.matmul %60, %58, %cst_36 {dimension_numbers = #tpu.dot_dimension_numbers<[1], [0], [0], [1], [0, 0, 1, 1], [], []>} : vector<8x32xf32>, vector<32x36xf32>, vector<8x36xf32> -> vector<8x36xf32>
    %64 = vector.broadcast %62 : vector<8x1xf32> to vector<8x36xf32>
    %65 = arith.addf %63, %64 : vector<8x36xf32>
    %cst_37 = arith.constant 0.000000e+00 : f32
    %66 = vector.broadcast %cst_37 : f32 to vector<8x36xf32>
    %67 = arith.maximumf %65, %66 : vector<8x36xf32>
    %c3_38 = arith.constant 3 : index
    %c0_39 = arith.constant 0 : index
    %c0_40 = arith.constant 0 : index
    %68 = vector.load %arg4[%c3_38, %c0_39, %c0_40] : memref<4x1x36xf32, #tpu.memory_space<vmem>>, vector<1x1x36xf32>
    %69 = vector.shape_cast %68 : vector<1x1x36xf32> to vector<1x36xf32>
    %70 = vector.broadcast %69 : vector<1x36xf32> to vector<8x36xf32>
    %71 = arith.mulf %67, %70 : vector<8x36xf32>
    %c0_41 = arith.constant 0 : index
    %c0_42 = arith.constant 0 : index
    %72 = vector.load %arg5[%c0_41, %c0_42] : memref<8x36xf32, #tpu.memory_space<vmem>>, vector<8x36xf32>
    tpu.vector_store %arg5[%c0_41, %c0_42], %71 {strides = array<i32>} : memref<8x36xf32, #tpu.memory_space<vmem>>, vector<8x36xf32>,
    return
  }
  func.func @transform_0(%arg0: i32) -> (i32, i32) {
    %c0_i32 = arith.constant 0 : i32
    %c0_i32_0 = arith.constant 0 : i32
    return %c0_i32, %arg0 : i32, i32
  }
  func.func @transform_1(%arg0: i32) -> (i32, i32, i32) {
    %c0_i32 = arith.constant 0 : i32
    %c0_i32_0 = arith.constant 0 : i32
    %c0_i32_1 = arith.constant 0 : i32
    %c0_i32_2 = arith.constant 0 : i32
    return %c0_i32, %c0_i32_0, %c0_i32_1 : i32, i32, i32
  }
  func.func @transform_2(%arg0: i32) -> (i32, i32, i32) {
    %c0_i32 = arith.constant 0 : i32
    %c0_i32_0 = arith.constant 0 : i32
    %c0_i32_1 = arith.constant 0 : i32
    %c0_i32_2 = arith.constant 0 : i32
    return %c0_i32, %c0_i32_0, %c0_i32_1 : i32, i32, i32
  }
  func.func @transform_3(%arg0: i32) -> (i32, i32, i32) {
    %c0_i32 = arith.constant 0 : i32
    %c0_i32_0 = arith.constant 0 : i32
    %c0_i32_1 = arith.constant 0 : i32
    %c0_i32_2 = arith.constant 0 : i32
    return %c0_i32, %c0_i32_0, %c0_i32_1 : i32, i32, i32
  }
  func.func @transform_4(%arg0: i32) -> (i32, i32) {
    %c0_i32 = arith.constant 0 : i32
    %c0_i32_0 = arith.constant 0 : i32
    return %c0_i32, %arg0 : i32, i32
  }
}

</mosaic_0001>

<bundles_post_ra>
// kernel: tpu_custom_call.1
= control target key start
LH: loop header
LB: loop body
LE: loop exit
PB: predicated region body
PF: predicated region fallthrough
CT: control target
= control target key end

     0   :  { %9 = vsyncpa [#allocation3], 0  ;;  %s870_s0 = inlined_call_operand.hbm [shape: f32[8,36], index: 0, kind: input, shape index: {}]   ;;  %s871_s1 = inlined_call_operand.vmem [shape: f32[4,16,32], index: 1, kind: input, shape index: {}]   ;;  %s872_s2 = inlined_call_operand.vmem [shape: f32[4,16,1], index: 2, kind: input, shape index: {}]   ;;  %s873_s3 = inlined_call_operand.vmem [shape: f32[4,1,36], index: 3, kind: input, shape index: {}]   ;;  %s874_s4 = inlined_call_operand.hbm [shape: f32[8,36], index: 4, kind: output, shape index: {}]  }
   0x1   :  { %10 = vsyncpa [#allocation4], 0  ;;  %s735_s15 = smov [#allocation2]   ;;  %s687_s19 = scalar_lea.hbm %s870_s0, 128 }
   0x2   :  { %s17_s16 = sshll.u32 %s735_s15, 4  ;;  %p688_p0 = scmp.ne.s32.totalorder %s870_s0, %s687_s19  ;;  %s18_s16 = int_to_ptr.vmem [resolvable:$true] %s17_s16 }
   0x3   :  { %p691_p1 = scmp.lt.u32.totalorder %s687_s19, %s870_s0 }
   0x5   :  { %p693_p2 = pnand %p691_p1, %p688_p0 }
   0x7   :  { %696 = shalt.err (!%p693_p2)
}
   0x8   :  { %s697_s24 = scalar_lea.vmem %s18_s16, 128  ;;  %p702_p4 = scmp.lt.s32.totalorder %s18_s16, %s18_s16 }
   0x9   :  { %p698_p3 = scmp.ne.s32.totalorder %s18_s16, %s697_s24  ;;  %p703_p5 = scmp.lt.s32.totalorder %s697_s24, %s697_s24 }
   0xb   :  { %p704_p6 = por %p703_p5, %p702_p4 }
   0xd   :  { %p705_p7 = pnand %p704_p6, %p698_p3 }
   0xf   :  { %708 = shalt.err (!%p705_p7)
}
  0x10   :  { %20 = dma.hbm_to_vmem [thread:$0]  %s870_s0, 128, %s18_s16, [#allocation3]  }
  0x11   :  { %731 = dma.done.wait [#allocation3], 128  }
  0x12   :  { %732 = vsyncadd [#allocation3], 4294967168  ;;  %vm62_vm0 = vcmask 195584   ;;  %v30_v0 = vld [vmem:[#allocation2] sm:$0xff]  ;;  %s736_s29 = smov 93   ;;  %s737_s30 = smov 127  }
  0x13   :  { %v48_v1 = vld [vmem:[%s871_s1] sm:$0xff]  ;;  %32 = vrot.lane.b32.xlu0 %v30_v0, %s736_s29  ;;  %40 = vrot.lane.b32.xlu1 %v30_v0, %s737_s30  ;;  %v738_v2 = vmov 0   ;;  %s739_s5 = smov 1   ;;  %s740_s0 = smov 35   ;;  %v51_v3 = vld [vmem:[%s872_s2 + $0x8] sm:$0xff]  ;;  %vm38_vm1 = vcmask 7168  }
  0x14   :  { %583 = vmatprep.mubr.msk.f32.mxu0 %vm62_vm0, %v48_v1  ;;  %656 = vset.pattern.permute.xlu1 %v738_v2  ;;  %v50_v4 = vld [vmem:[%s872_s2] sm:$0xff]  ;;  %vm46_vm2 = vcmask 285696   ;;  %v49_v12 = vld [vmem:[%s871_s1 + $0x8] sm:$0xff]  ;;  %v534_v21 = vld [vmem:[%s871_s1 + $0x10] sm:$0xff]  ;;  %vm187_vm3 = vcmask 261120   ;;  %v741_v1 = vmov 0.0|0.0  }
  0x15   :  { %655 = vset.pattern.permute.xlu0 %v738_v2  ;;  %v533_v18 = vld [vmem:[%s873_s3] ss:$0 sm:$0xff]  ;;  %594 = vmatprep.mubr.msk.f32.mxu1 %vm187_vm3, %v534_v21  ;;  %v537_v27 = vld [vmem:[%s872_s2 + $0x18] sm:$0xff]  ;;  %v536_v28 = vld [vmem:[%s872_s2 + $0x10] sm:$0xff]  ;;  %vm742_vm4 = vmmov 0   ;;  %s744_s12 = smov [#allocation5]  }
  0x16   :  { %v535_v38 = vld [vmem:[%s871_s1 + $0x18] sm:$0xff]  ;;  %v541_v44 = vld [vmem:[%s873_s3 + $0x1] ss:$0 sm:$0xff]  ;;  %v545_v53 = vld [vmem:[%s872_s2 + $0x28] sm:$0xff]  ;;  %s522_s13 = sshll.u32 %s744_s12, 4  ;;  %vm514_vm5 = vcmask 293888   ;;  %s523_s13 = int_to_ptr.vmem [resolvable:$true] %s522_s13 }
  0x17   :  { %35 = vrot.lane.b32.xlu0 %v30_v0, %s739_s5  ;;  %43 = vrot.lane.b32.xlu1 %v30_v0, %s740_s0  ;;  %v542_v47 = vld [vmem:[%s871_s1 + $0x20] sm:$0xff]  ;;  %s709_s14 = scalar_lea.vmem %s523_s13, 128  ;;  %p714_p9 = scmp.lt.s32.totalorder %s523_s13, %s523_s13 }
  0x18   :  { %v544_v54 = vld [vmem:[%s872_s2 + $0x20] sm:$0xff]  ;;  %p710_p8 = scmp.ne.s32.totalorder %s523_s13, %s709_s14  ;;  %p715_p10 = scmp.lt.s32.totalorder %s709_s14, %s709_s14 }
  0x1a   :  { %p716_p11 = por %p715_p10, %p714_p9 }
  0x1b   :  { %59 = vperm.xlu1 %656, %v51_v3   ;;  %54 = vperm.xlu0 %655, %v50_v4  }
  0x1c   :  { %p717_p12 = pnand %p716_p11, %p710_p8 }
  0x85   :  { %v33_v5 = vpop.permute.xlu0 %32  ;;  %v41_v6 = vpop.permute.xlu1 %40 }
  0x89   :  { %v36_v7 = vpop.permute.xlu0 %35  ;;  %v44_v9 = vpop.permute.xlu1 %43 }
  0x8a   :  { %v39_v8 = vsel %vm38_vm1, %v33_v5, %v36_v7  ;;  %v47_v11 = vsel %vm46_vm2, %v41_v6, %v44_v9  ;;  %v549_v7 = vld [vmem:[%s873_s3 + $0x2] ss:$0 sm:$0xff] }
  0x8b   :  { %v619_v10 = vpack.c.bf16 %v30_v0, %v39_v8  ;;  %v543_v0 = vld [vmem:[%s871_s1 + $0x28] sm:$0xff] }
  0x8d   :  { %620 = vmatprep.subr.bf16.mxu0 %v619_v10 }
  0x8e   :  { %622 = vmatpush3.bf16.msra.mxu0 %v619_v10  ;;  %v743_v10 = vmov 0.0  }
  0x8f   :  { %581 = vmatprep.subr.mxu0 %v47_v11 }
  0x92   :  { %582 = vmatpush3.msra.mxu0 %v47_v11 }
  0x93   :  { %584 = vmatmul.mubr.msk.f32.vlgmr.msra.gmra.mrb[0].mxu0 %vm62_vm0, %v49_v12 }
  0x94   :  { %605 = vmatprep.mubr.msk.f32.mxu0 %vm187_vm3, %v542_v47 }
  0x9a   :  { %v60_v13 = vpop.permute.xlu1 %59  ;;  %v55_v14 = vpop.permute.xlu0 %54 }
 0x166   :  { %v585_v15 = vpop.f32.mrb[0].mxu0 }
 0x167   :  { %v141_v16 = vadd.f32 %v585_v15, %v60_v13  ;;  %v135_v17 = vpop.f32.mrb[1].mxu0 }
 0x168   :  { %v136_v19 = vadd.f32 %v135_v17, %v55_v14 }
 0x169   :  { %v145_v20 = vmax.f32 %v141_v16, 0.0  ;;  %v551_v16 = vld [vmem:[%s872_s2 + $0x30] sm:$0xff] }
 0x16a   :  { %v144_v22 = vmax.f32 %v136_v19, 0.0 }
 0x16b   :  { %v154_v23 = vmul.f32 %v533_v18, %v145_v20 }
 0x16c   :  { %v153_v24 = vmul.f32 %v533_v18, %v144_v22 }
 0x16e   :  { %v662_v25 = vpack.i.bf16 %v154_v23, %v153_v24  ;;  %v623_v26 = vpack.c.bf16 %v154_v23, %v153_v24 }
 0x170   :  { %663 = vrot.lane.b32.xlu0 %v662_v25, %s740_s0  ;;  %658 = vrot.lane.b32.xlu1 %v662_v25, %s737_s30 }
 0x171   :  { %624 = vmatprep.subr.bf16.mxu1 %v623_v26 }
 0x172   :  { %626 = vmatpush3.bf16.msra.mxu1 %v623_v26  ;;  %v550_v26 = vld [vmem:[%s871_s1 + $0x30] sm:$0xff] }
 0x174   :  { %184 = vperm.xlu0 %655, %v537_v27   ;;  %179 = vperm.xlu1 %656, %v536_v28  }
 0x1e2   :  { %v664_v29 = vpop.permute.xlu0 %663  ;;  %v659_v30 = vpop.permute.xlu1 %658 }
 0x1e3   :  { %v666_v31 = vunpack.i.h.bf16 %v664_v29  ;;  %v665_v32 = vunpack.i.l.bf16 %v664_v29  ;;  %v661_v33 = vunpack.i.h.bf16 %v659_v30  ;;  %v660_v34 = vunpack.i.l.bf16 %v659_v30 }
 0x1e5   :  { %v169_v35 = vsel %vm46_vm2, %v660_v34, %v665_v32  ;;  %v170_v36 = vsel %vm46_vm2, %v661_v33, %v666_v31  ;;  %v554_v31 = vld [vmem:[%s873_s3 + $0x3] ss:$0 sm:$0xff] }
 0x1e6   :  { %v627_v37 = vpack.c.bf16 %v170_v36, %v169_v35 }
 0x1e8   :  { %628 = vmatprep.subr.bf16.mxu1 %v627_v37 }
 0x1e9   :  { %630 = vmatpush3.bf16.msra.mxu1 %v627_v37 }
 0x1ea   :  { %639 = vmatprep.subr.bf16.mxu1 %v741_v1 }
 0x1ec   :  { %595 = vmatmul.mubr.msk.f32.vlgmr.msra.gmra.mrb[0].mxu1 %vm187_vm3, %v535_v38 }
 0x1ed   :  { %616 = vmatprep.mubr.msk.f32.mxu1 %vm742_vm4, %v743_v10 }
 0x1f3   :  { %v185_v39 = vpop.permute.xlu0 %184  ;;  %v180_v41 = vpop.permute.xlu1 %179 }
 0x2bf   :  { %v596_v40 = vpop.f32.mrb[0].mxu1 }
 0x2c0   :  { %v266_v42 = vadd.f32 %v596_v40, %v185_v39  ;;  %v260_v43 = vpop.f32.mrb[1].mxu1 }
 0x2c1   :  { %v261_v45 = vadd.f32 %v260_v43, %v180_v41 }
 0x2c2   :  { %v270_v46 = vmax.f32 %v266_v42, 0.0 }
 0x2c3   :  { %v269_v48 = vmax.f32 %v261_v45, 0.0 }
 0x2c4   :  { %v280_v49 = vmul.f32 %v541_v44, %v270_v46 }
 0x2c5   :  { %v279_v50 = vmul.f32 %v541_v44, %v269_v48 }
 0x2c7   :  { %v672_v51 = vpack.i.bf16 %v280_v49, %v279_v50  ;;  %v631_v52 = vpack.c.bf16 %v280_v49, %v279_v50 }
 0x2c9   :  { %673 = vrot.lane.b32.xlu0 %v672_v51, %s740_s0  ;;  %668 = vrot.lane.b32.xlu1 %v672_v51, %s737_s30 }
 0x2ca   :  { %632 = vmatprep.subr.bf16.mxu0 %v631_v52 }
 0x2cb   :  { %634 = vmatpush3.bf16.msra.mxu0 %v631_v52 }
 0x2cd   :  { %310 = vperm.xlu0 %655, %v545_v53   ;;  %305 = vperm.xlu1 %656, %v544_v54  }
 0x33b   :  { %v674_v55 = vpop.permute.xlu0 %673  ;;  %v669_v56 = vpop.permute.xlu1 %668 }
 0x33c   :  { %v676_v57 = vunpack.i.h.bf16 %v674_v55  ;;  %v675_v58 = vunpack.i.l.bf16 %v674_v55  ;;  %v671_v59 = vunpack.i.h.bf16 %v669_v56  ;;  %v670_v60 = vunpack.i.l.bf16 %v669_v56 }
 0x33e   :  { %v295_v61 = vsel %vm46_vm2, %v670_v60, %v675_v58  ;;  %v296_v62 = vsel %vm46_vm2, %v671_v59, %v676_v57 }
 0x33f   :  { %v635_v63 = vpack.c.bf16 %v296_v62, %v295_v61 }
 0x341   :  { %636 = vmatprep.subr.bf16.mxu0 %v635_v63 }
 0x342   :  { %638 = vmatpush3.bf16.msra.mxu0 %v635_v63 }
 0x345   :  { %606 = vmatmul.mubr.msk.f32.vlgmr.msra.gmra.mrb[2].mxu0 %vm187_vm3, %v543_v0 }
 0x34c   :  { %v311_v2 = vpop.permute.xlu0 %310  ;;  %v306_v4 = vpop.permute.xlu1 %305 }
 0x418   :  { %v607_v3 = vpop.f32.mrb[2].mxu0 }
 0x419   :  { %v391_v5 = vadd.f32 %v607_v3, %v311_v2  ;;  %v385_v6 = vpop.f32.mrb[3].mxu0 }
 0x41a   :  { %v386_v8 = vadd.f32 %v385_v6, %v306_v4 }
 0x41b   :  { %v395_v9 = vmax.f32 %v391_v5, 0.0 }
 0x41c   :  { %v394_v11 = vmax.f32 %v386_v8, 0.0 }
 0x41d   :  { %v405_v12 = vmul.f32 %v549_v7, %v395_v9 }
 0x41e   :  { %v404_v13 = vmul.f32 %v549_v7, %v394_v11 }
 0x420   :  { %v682_v14 = vpack.i.bf16 %v405_v12, %v404_v13  ;;  %v640_v15 = vpack.c.bf16 %v405_v12, %v404_v13 }
 0x422   :  { %683 = vrot.lane.b32.xlu0 %v682_v14, %s740_s0  ;;  %678 = vrot.lane.b32.xlu1 %v682_v14, %s737_s30 }
 0x423   :  { %641 = vmatpush3.bf16.msra.mxu1 %v640_v15 }
 0x424   :  { %642 = vmatprep.subr.bf16.mxu1 %v741_v1 }
 0x426   :  { %428 = vperm.xlu1 %656, %v551_v16  }
 0x494   :  { %v684_v17 = vpop.permute.xlu0 %683  ;;  %v679_v18 = vpop.permute.xlu1 %678 }
 0x495   :  { %v686_v19 = vunpack.i.h.bf16 %v684_v17  ;;  %v685_v20 = vunpack.i.l.bf16 %v684_v17  ;;  %v681_v21 = vunpack.i.h.bf16 %v679_v18  ;;  %v680_v22 = vunpack.i.l.bf16 %v679_v18 }
 0x497   :  { %v421_v23 = vsel %vm46_vm2, %v681_v21, %v686_v19  ;;  %v420_v24 = vsel %vm46_vm2, %v680_v22, %v685_v20 }
 0x498   :  { %v643_v25 = vpack.c.bf16 %v421_v23, %v420_v24 }
 0x49a   :  { %644 = vmatpush3.bf16.msra.mxu1 %v643_v25 }
 0x49d   :  { %617 = vmatmul.mubr.msk.f32.vlgmr.msra.gmra.mrb[2].mxu1 %vm187_vm3, %v550_v26 }
 0x4a5   :  { %v429_v27 = vpop.permute.xlu1 %428 }
 0x570   :  { %v500_v28 = vpop.f32.mrb[2].mxu1 }
 0x571   :  { %v501_v29 = vadd.f32 %v500_v28, %v429_v27  ;;  %v618_v30 = vpop.f32.mrb[3].mxu1 }
 0x573   :  { %v504_v32 = vmax.f32 %v501_v29, 0.0 }
 0x575   :  { %v513_v33 = vmul.f32 %v554_v31, %v504_v32 }
 0x577   :  { %515 = vst.msk [vmem:[#allocation5] sm:$0xff] %vm514_vm5, %v513_v33 }
 0x578   :  { %720 = shalt.err (!%p717_p12)
}
 0x579   :  { %s721_s16 = scalar_lea.hbm %s874_s4, 128 }
 0x57a   :  { %p722_p13 = scmp.ne.s32.totalorder %s874_s4, %s721_s16  ;;  %p725_p0 = scmp.lt.u32.totalorder %s721_s16, %s874_s4 }
 0x57c   :  { %p727_p1 = pnand %p725_p0, %p722_p13 }
 0x57e   :  { %730 = shalt.err (!%p727_p1)
}
 0x57f   :  { %525 = dma.vmem_to_hbm [thread:$0]  %s523_s13, 128, %s874_s4, [#allocation4]  }
 0x580   :  { %733 = dma.done.wait [#allocation4], 128  }
 0x581   :  { %734 = vsyncadd [#allocation4], 4294967168 }
 0x582   :  { %529 = vsyncpa [#allocation3], 1 }
 0x583   :  { %530 = vsyncpa [#allocation4], 1 }

</bundles_post_ra>
